<compile_context>
chip_gen: v5e
topology: v5e:2x2
jax: 0.10.0
libtpu: 0.0.40
codegen_flags: <defaults>
</compile_context>

<pallas_src>
import functools

import jax
import jax.numpy as jnp
from jax.experimental import pallas as pl
from jax.experimental.pallas import tpu as pltpu


def _round_up(x, m):
    return ((x + m - 1) // m) * m


def _actor_mlp_kernel(x_ref, w1_ref, b1_ref, w2_ref, b2_ref, o_ref, *,
                      matmul_dtype):
    # x_ref:  (TB, 128) f32   w1_ref: (128, 64)   b1_ref: (1, 64) f32
    # w2_ref: (64, A)         b2_ref: (1, A) f32  o_ref:  (TB, A) f32
    #
    # Cast activations to the matmul dtype *inside* the kernel: x stays f32 in
    # HBM (no extra HBM cast pass) while the MXU runs bf16 when requested.
    x = x_ref[...].astype(matmul_dtype)
    # Layer 1: Linear(128 -> 64), f32 accumulation on the MXU; bias + ReLU in
    # f32 on the VPU (safe on every generation, incl. v5e without bf16 VPU).
    h = jnp.dot(x, w1_ref[...], preferred_element_type=jnp.float32) + b1_ref[...]
    h = jnp.maximum(h, 0.0)
    # Layer 2: Linear(64 -> A), unpadded -- the (TB, A) store block's last dim
    # equals the full output dim, so writeback only touches the real A columns.
    out = jnp.dot(h.astype(w2_ref.dtype), w2_ref[...],
                  preferred_element_type=jnp.float32) + b2_ref[...]
    o_ref[...] = out.astype(o_ref.dtype)


def actor_forward(hidden_states, inputs, params, *, block_batch=4096,
                  matmul_dtype=jnp.float32):
    """Pallas implementation of ActorModel.forward.

    hidden_states: [B, 128] float32
    inputs:        ignored (matches the reference module)
    params:        dict with w1 [128,64], b1 [64], w2 [64,A], b2 [A]
                   (weights stored [in, out] == PyTorch's x @ W.T convention)
    block_batch:   max batch tile size (double-buffered x tile of 4096x128 f32
                   is ~4 MiB of VMEM -- fits every generation's default limit)
    matmul_dtype:  jnp.float32 (exact) or jnp.bfloat16 (recommended on
                   v5e/v6e/v7x; f32 accumulation + f32 epilogue either way)
    """
    del inputs  # unused by the reference forward
    w1, b1, w2, b2 = params["w1"], params["b1"], params["w2"], params["b2"]
    B, D = hidden_states.shape
    H = w1.shape[1]
    A = w2.shape[1]

    # Weights/biases are tiny: cast/reshape once in the wrapper, and pin them
    # to block (0, 0) so they stay VMEM-resident across all grid steps.
    w1_c = w1.astype(matmul_dtype)
    w2_c = w2.astype(matmul_dtype)
    b1_r = b1.reshape(1, H).astype(jnp.float32)
    b2_r = b2.reshape(1, A).astype(jnp.float32)

    # Batch tile: multiple of the sublane tile (16 keeps sub-32-bit packing
    # native if the matmul dtype is 2-byte), capped at ~ceil(B/2) so the grid
    # has at least 2 steps when B is big enough (lets v7x's two TensorCores
    # split the work), and never below one sublane tile.  No jnp.pad of x:
    # Pallas masks the ragged last block on writeback.
    sub = 16 if jnp.dtype(matmul_dtype).itemsize < 4 else 8
    tb = min(block_batch, _round_up(pl.cdiv(B, 2), sub), _round_up(B, sub))
    tb = max(tb, sub)
    grid = (pl.cdiv(B, tb),)

    x_item = jnp.dtype(hidden_states.dtype).itemsize
    w_item = jnp.dtype(matmul_dtype).itemsize
    cost = pl.CostEstimate(
        flops=2 * B * (D * H + H * A),
        transcendentals=0,
        bytes_accessed=(B * D * x_item          # x (read once, f32 in HBM)
                        + D * H * w_item        # w1
                        + H * A * w_item        # w2 (unpadded)
                        + (H + A) * 4           # biases
                        + B * A * 4),           # output (unpadded)
    )

    out = pl.pallas_call(
        functools.partial(_actor_mlp_kernel, matmul_dtype=matmul_dtype),
        out_shape=jax.ShapeDtypeStruct((B, A), jnp.float32),
        grid=grid,
        in_specs=[
            pl.BlockSpec((tb, D), lambda i: (i, 0)),   # x tile walks the batch
            pl.BlockSpec((D, H), lambda i: (0, 0)),    # w1: VMEM-resident
            pl.BlockSpec((1, H), lambda i: (0, 0)),    # b1: VMEM-resident
            pl.BlockSpec((H, A), lambda i: (0, 0)),    # w2: VMEM-resident
            pl.BlockSpec((1, A), lambda i: (0, 0)),    # b2: VMEM-resident
        ],
        out_specs=pl.BlockSpec((tb, A), lambda i: (i, 0)),
        compiler_params=pltpu.CompilerParams(
            # TODO(synk): benchmark pltpu.CORE_PARALLEL here on v7x; plain
            # "parallel" is the safe default on single-TC chips.
            dimension_semantics=("parallel",),
        ),
        cost_estimate=cost,
    )(hidden_states, w1_c, b1_r, w2_c, b2_r)

    return out


def init_params(key, action_size):
    """Deterministic parameter init (same shapes as the PyTorch module)."""
    k1, k2, k3, k4 = jax.random.split(key, 4)
    w1 = jax.random.normal(k1, (128, 64), jnp.float32) * 0.05
    b1 = jax.random.normal(k2, (64,), jnp.float32) * 0.01
    w2 = jax.random.normal(k3, (64, action_size), jnp.float32) * 0.05
    b2 = jax.random.normal(k4, (action_size,), jnp.float32) * 0.01
    return {"w1": w1, "b1": b1, "w2": w2, "b2": b2}


if __name__ == "__main__":
    key = jax.random.PRNGKey(0)
    k_x, k_in, k_p = jax.random.split(key, 3)

    batch = 8
    action_size = 8

    hidden_states = jax.random.normal(k_x, (batch, 128), jnp.float32)
    inputs = jax.random.normal(k_in, (batch, 16), jnp.float32)  # ignored, as in reference
    params = init_params(k_p, action_size)

    # Pure-JAX reference.
    h_ref = jnp.maximum(hidden_states @ params["w1"] + params["b1"], 0.0)
    ref = h_ref @ params["w2"] + params["b2"]

    # f32 path (default): exact parity with the reference module.
    out = actor_forward(hidden_states, inputs, params)
    out = jax.block_until_ready(out)
    assert out.shape == (batch, action_size)
    assert jnp.allclose(out, ref, atol=1e-5, rtol=1e-5)

    # bf16 matmul-operand path (in-kernel cast; recommended on all gens).
    out_bf16 = actor_forward(hidden_states, inputs, params,
                             matmul_dtype=jnp.bfloat16)
    out_bf16 = jax.block_until_ready(out_bf16)
    assert jnp.allclose(out_bf16, ref, atol=5e-2, rtol=5e-2)

    # Larger batch exercising the cdiv grid (B=3000 -> TB=1504, grid=(2,),
    # ragged last block masked on writeback) with no wrapper-side padding.
    big_b = 3000
    x_big = jax.random.normal(jax.random.PRNGKey(1), (big_b, 128), jnp.float32)
    out_big = actor_forward(x_big, None, params)
    out_big = jax.block_until_ready(out_big)
    ref_big = (jnp.maximum(x_big @ params["w1"] + params["b1"], 0.0)
               @ params["w2"] + params["b2"])
    assert out_big.shape == (big_b, action_size)
    assert jnp.allclose(out_big, ref_big, atol=1e-4, rtol=1e-4)

    print("KERNEL_OK")
</pallas_src>

<mosaic_0001>
module attributes {stable_mosaic.version = 11 : i64} {
  func.func @_actor_mlp_kernel(%arg0: i32, %arg1: memref<8x128xf32, #tpu.memory_space<vmem>>, %arg2: memref<128x64xf32, #tpu.memory_space<vmem>>, %arg3: memref<1x64xf32, #tpu.memory_space<vmem>>, %arg4: memref<64x8xf32, #tpu.memory_space<vmem>>, %arg5: memref<1x8xf32, #tpu.memory_space<vmem>>, %arg6: memref<8x8xf32, #tpu.memory_space<vmem>>) attributes {dimension_semantics = [#tpu.dimension_semantics<parallel>], iteration_bounds = array<i64: 1>, scalar_prefetch = 0 : i64, scratch_operands = 0 : i64, tpu.core_type = #tpu.core_type<tc>, window_params = [{transform_indices = @transform_0, window_bounds = array<i64: 8, 128>}, {pipeline_mode = #tpu.pipeline_mode<synchronous>, transform_indices = @transform_1, window_bounds = array<i64: 128, 64>}, {pipeline_mode = #tpu.pipeline_mode<synchronous>, transform_indices = @transform_2, window_bounds = array<i64: 1, 64>}, {pipeline_mode = #tpu.pipeline_mode<synchronous>, transform_indices = @transform_3, window_bounds = array<i64: 64, 8>}, {pipeline_mode = #tpu.pipeline_mode<synchronous>, transform_indices = @transform_4, window_bounds = array<i64: 1, 8>}, {transform_indices = @transform_5, window_bounds = array<i64: 8, 8>}]} {
    %c0 = arith.constant 0 : index
    %c0_0 = arith.constant 0 : index
    %0 = vector.load %arg1[%c0, %c0_0] : memref<8x128xf32, #tpu.memory_space<vmem>>, vector<8x128xf32>
    %c0_1 = arith.constant 0 : index
    %c0_2 = arith.constant 0 : index
    %1 = vector.load %arg2[%c0_1, %c0_2] : memref<128x64xf32, #tpu.memory_space<vmem>>, vector<128x64xf32>
    %cst = arith.constant dense<0.000000e+00> : vector<8x64xf32>
    %2 = tpu.matmul %0, %1, %cst {dimension_numbers = #tpu.dot_dimension_numbers<[1], [0], [0], [1], [0, 0, 1, 1], [], []>} : vector<8x128xf32>, vector<128x64xf32>, vector<8x64xf32> -> vector<8x64xf32>
    %c0_3 = arith.constant 0 : index
    %c0_4 = arith.constant 0 : index
    %3 = vector.load %arg3[%c0_3, %c0_4] : memref<1x64xf32, #tpu.memory_space<vmem>>, vector<1x64xf32>
    %4 = vector.broadcast %3 : vector<1x64xf32> to vector<8x64xf32>
    %5 = arith.addf %2, %4 : vector<8x64xf32>
    %cst_5 = arith.constant 0.000000e+00 : f32
    %6 = vector.broadcast %cst_5 : f32 to vector<8x64xf32>
    %7 = arith.maximumf %5, %6 : vector<8x64xf32>
    %c0_6 = arith.constant 0 : index
    %c0_7 = arith.constant 0 : index
    %8 = vector.load %arg4[%c0_6, %c0_7] : memref<64x8xf32, #tpu.memory_space<vmem>>, vector<64x8xf32>
    %cst_8 = arith.constant dense<0.000000e+00> : vector<8x8xf32>
    %9 = tpu.matmul %7, %8, %cst_8 {dimension_numbers = #tpu.dot_dimension_numbers<[1], [0], [0], [1], [0, 0, 1, 1], [], []>} : vector<8x64xf32>, vector<64x8xf32>, vector<8x8xf32> -> vector<8x8xf32>
    %c0_9 = arith.constant 0 : index
    %c0_10 = arith.constant 0 : index
    %10 = vector.load %arg5[%c0_9, %c0_10] : memref<1x8xf32, #tpu.memory_space<vmem>>, vector<1x8xf32>
    %11 = vector.broadcast %10 : vector<1x8xf32> to vector<8x8xf32>
    %12 = arith.addf %9, %11 : vector<8x8xf32>
    %c0_11 = arith.constant 0 : index
    %c0_12 = arith.constant 0 : index
    %13 = vector.load %arg6[%c0_11, %c0_12] : memref<8x8xf32, #tpu.memory_space<vmem>>, vector<8x8xf32>
    tpu.vector_store %arg6[%c0_11, %c0_12], %12 {strides = array<i32>} : memref<8x8xf32, #tpu.memory_space<vmem>>, vector<8x8xf32>,
    return
  }
  func.func @transform_0(%arg0: i32) -> (i32, i32) {
    %c0_i32 = arith.constant 0 : i32
    %c0_i32_0 = arith.constant 0 : i32
    return %arg0, %c0_i32 : i32, i32
  }
  func.func @transform_1(%arg0: i32) -> (i32, i32) {
    %c0_i32 = arith.constant 0 : i32
    %c0_i32_0 = arith.constant 0 : i32
    %c0_i32_1 = arith.constant 0 : i32
    return %c0_i32, %c0_i32_0 : i32, i32
  }
  func.func @transform_2(%arg0: i32) -> (i32, i32) {
    %c0_i32 = arith.constant 0 : i32
    %c0_i32_0 = arith.constant 0 : i32
    %c0_i32_1 = arith.constant 0 : i32
    return %c0_i32, %c0_i32_0 : i32, i32
  }
  func.func @transform_3(%arg0: i32) -> (i32, i32) {
    %c0_i32 = arith.constant 0 : i32
    %c0_i32_0 = arith.constant 0 : i32
    %c0_i32_1 = arith.constant 0 : i32
    return %c0_i32, %c0_i32_0 : i32, i32
  }
  func.func @transform_4(%arg0: i32) -> (i32, i32) {
    %c0_i32 = arith.constant 0 : i32
    %c0_i32_0 = arith.constant 0 : i32
    %c0_i32_1 = arith.constant 0 : i32
    return %c0_i32, %c0_i32_0 : i32, i32
  }
  func.func @transform_5(%arg0: i32) -> (i32, i32) {
    %c0_i32 = arith.constant 0 : i32
    %c0_i32_0 = arith.constant 0 : i32
    return %arg0, %c0_i32 : i32, i32
  }
}

</mosaic_0001>

<bundles_post_ra>
// kernel: tpu_custom_call.1
= control target key start
LH: loop header
LB: loop body
LE: loop exit
PB: predicated region body
PF: predicated region fallthrough
CT: control target
= control target key end

     0   :  { %s262_s0 = inlined_call_operand.vmem [shape: f32[8,128], index: 0, kind: input, shape index: {}]   ;;  %s263_s1 = inlined_call_operand.vmem [shape: f32[128,64], index: 1, kind: input, shape index: {}]   ;;  %s264_s2 = inlined_call_operand.vmem [shape: f32[1,64], index: 2, kind: input, shape index: {}]   ;;  %s265_s3 = inlined_call_operand.vmem [shape: f32[64,8], index: 3, kind: input, shape index: {}]   ;;  %s266_s4 = inlined_call_operand.vmem [shape: f32[1,8], index: 4, kind: input, shape index: {}]   ;;  %s267_s5 = inlined_call_operand.hbm [shape: f32[8,8], index: 5, kind: output, shape index: {}]  }
   0x1   :  { %v37_v0 = vld [vmem:[%s263_s1 + $0x78] sm:$0xff]  ;;  %v36_v1 = vld [vmem:[%s263_s1 + $0x70] sm:$0xff]  ;;  %v35_v2 = vld [vmem:[%s263_s1 + $0x68] sm:$0xff] }
   0x2   :  { %42 = vmatpush.msra.mxu0 %v37_v0  ;;  %v34_v3 = vld [vmem:[%s263_s1 + $0x60] sm:$0xff]  ;;  %v70_v4 = vld [vmem:[%s265_s3 + $0x38] sm:$0xff]  ;;  %v69_v6 = vld [vmem:[%s265_s3 + $0x30] sm:$0xff] }
   0x3   :  { %v33_v5 = vld [vmem:[%s263_s1 + $0x58] sm:$0xff]  ;;  %87 = vmatpush.msra.mxu1 %v70_v4  ;;  %v68_v7 = vld [vmem:[%s265_s3 + $0x28] sm:$0xff]  ;;  %v32_v8 = vld [vmem:[%s263_s1 + $0x50] sm:$0xff] }
   0x4   :  { %43 = vmatpush.msra.mxu0 %v36_v1 }
   0x5   :  { %88 = vmatpush.msra.mxu1 %v69_v6 }
   0x6   :  { %44 = vmatpush.msra.mxu0 %v35_v2 }
   0x8   :  { %45 = vmatpush.msra.mxu0 %v34_v3 }
   0x9   :  { %10 = vsyncpa [#allocation3], 0  ;;  %v67_v9 = vld [vmem:[%s265_s3 + $0x20] sm:$0xff]  ;;  %v31_v10 = vld [vmem:[%s263_s1 + $0x48] sm:$0xff]  ;;  %89 = vmatpush.msra.mxu1 %v68_v7  ;;  %vm75_vm0 = vcmask 523264   ;;  %s147_s20 = smov [#allocation2]  }
   0xa   :  { %46 = vmatpush.msra.mxu0 %v33_v5  ;;  %v66_v11 = vld [vmem:[%s265_s3 + $0x18] sm:$0xff]  ;;  %v30_v12 = vld [vmem:[%s263_s1 + $0x40] sm:$0xff]  ;;  %v28_v14 = vld [vmem:[%s263_s1 + $0x30] sm:$0xff]  ;;  %s106_s21 = sshll.u32 %s147_s20, 4  ;;  %vm99_vm1 = vcmask 64512   ;;  %s107_s21 = int_to_ptr.vmem [resolvable:$true] %s106_s21 }
   0xb   :  { %90 = vmatpush.msra.mxu1 %v67_v9  ;;  %v29_v13 = vld [vmem:[%s263_s1 + $0x38] sm:$0xff]  ;;  %v27_v15 = vld [vmem:[%s263_s1 + $0x28] sm:$0xff]  ;;  %v26_v16 = vld [vmem:[%s263_s1 + $0x20] sm:$0xff] }
   0xc   :  { %47 = vmatpush.msra.mxu0 %v32_v8  ;;  %v25_v17 = vld [vmem:[%s263_s1 + $0x18] sm:$0xff]  ;;  %v24_v18 = vld [vmem:[%s263_s1 + $0x10] sm:$0xff]  ;;  %v23_v19 = vld [vmem:[%s263_s1 + $0x8] sm:$0xff] }
   0xd   :  { %91 = vmatpush.msra.mxu1 %v66_v11  ;;  %v22_v20 = vld [vmem:[%s263_s1] sm:$0xff]  ;;  %v65_v22 = vld [vmem:[%s265_s3 + $0x10] sm:$0xff]  ;;  %v64_v23 = vld [vmem:[%s265_s3 + $0x8] sm:$0xff] }
   0xe   :  { %48 = vmatpush.msra.mxu0 %v31_v10  ;;  %v21_v21 = vld [vmem:[%s262_s0] sm:$0xff] }
   0xf   :  { %92 = vmatpush.msra.mxu1 %v65_v22  ;;  %v63_v24 = vld [vmem:[%s265_s3] sm:$0xff]  ;;  %s108_s3 = sshll.u32 %s267_s5, 4  ;;  %s109_s3 = int_to_ptr.hbm [resolvable:$true] %s108_s3 }
  0x10   :  { %49 = vmatpush.msra.mxu0 %v30_v12  ;;  %v119_v25 = vld [vmem:[%s264_s2] ss:$0 sm:$0xff] }
  0x11   :  { %93 = vmatpush.msra.mxu1 %v64_v23  ;;  %v120_v29 = vld [vmem:[%s266_s4] ss:$0 sm:$0xff] }
  0x12   :  { %50 = vmatpush.msra.mxu0 %v29_v13 }
  0x13   :  { %94 = vmatpush.msra.mxu1 %v63_v24 }
  0x14   :  { %51 = vmatpush.msra.mxu0 %v28_v14 }
  0x16   :  { %52 = vmatpush.msra.mxu0 %v27_v15 }
  0x18   :  { %53 = vmatpush.msra.mxu0 %v26_v16 }
  0x1a   :  { %54 = vmatpush.msra.mxu0 %v25_v17 }
  0x1c   :  { %55 = vmatpush.msra.mxu0 %v24_v18 }
  0x1e   :  { %56 = vmatpush.msra.mxu0 %v23_v19 }
  0x20   :  { %57 = vmatpush.msra.mxu0 %v22_v20 }
  0x21   :  { %58 = vmatmul.f32.vlgmr.msra.gmra.mxu0 %v21_v21 }
  0x9e   :  { %v59_v26 = vpop.f32.mrf.mxu0 }
  0x9f   :  { %v60_v27 = vadd.f32 %v119_v25, %v59_v26 }
  0xa1   :  { %v62_v28 = vmax.f32 %v60_v27, 0.0 }
  0xa3   :  { %117 = vmatmul.msk.f32.vlgmr.msra.gmra.mxu1 %vm75_vm0, %v62_v28 }
 0x120   :  { %v96_v30 = vpop.f32.mrf.mxu1 }
 0x121   :  { %v97_v31 = vadd.f32 %v120_v29, %v96_v30 }
 0x123   :  { %100 = vst.msk [vmem:[#allocation2] sm:$0xff] %vm99_vm1, %v97_v31 }
 0x124   :  { %111 = dma.vmem_to_hbm [thread:$0]  %s107_s21, 128, %s109_s3, [#allocation3]  }
 0x125   :  { %145 = dma.done.wait [#allocation3], 128  }
 0x126   :  { %146 = vsyncadd [#allocation3], 4294967168 }
 0x127   :  { %116 = vsyncpa [#allocation3], 1 }

</bundles_post_ra>
